<compile_context>
chip_gen: v5e
topology: v5e:2x2
jax: 0.10.0
libtpu: 0.0.40
codegen_flags: <defaults>
</compile_context>

<pallas_src>
import functools

import jax
import jax.numpy as jnp
from jax.experimental import pallas as pl
from jax.experimental.pallas import tpu as pltpu


# ---------------------------------------------------------------------------
# Kernel: single HBM -> HBM DMA of the first `rows` rows of the table.
# ---------------------------------------------------------------------------
def _pos_embed_dma_kernel(emb_hbm, out_hbm, sem, *, rows):
    # emb_hbm : (max_len, D) table, left in place (pl.ANY / HBM)
    # out_hbm : (rows, D) output, written directly by the DMA (pl.ANY / HBM)
    # The sliced source region is contiguous (rows * D elements), so this is a
    # single linear DMA regardless of sublane/lane alignment of rows or D.
    cp = pltpu.make_async_copy(emb_hbm.at[pl.ds(0, rows), :], out_hbm, sem)
    cp.start()
    cp.wait()


# ---------------------------------------------------------------------------
# Wrapper: LearnablePositionalEncoding.forward
# ---------------------------------------------------------------------------
def learnable_positional_encoding(x, pos_embedding):
    """Pallas equivalent of LearnablePositionalEncoding.forward.

    x             : (B, S) — only the sequence length S is consumed (as in PyTorch).
    pos_embedding : (max_len, d_model) learnable embedding table (nn.Embedding.weight).
    returns       : (1, S, d_model) == embedding(arange(S))[None].
    """
    _, S = x.shape
    max_len, D = pos_embedding.shape
    assert S <= max_len, "sequence length exceeds max_len (would be an index error in PyTorch)"

    itemsize = jnp.dtype(pos_embedding.dtype).itemsize
    kernel = functools.partial(_pos_embed_dma_kernel, rows=S)

    out = pl.pallas_call(
        kernel,
        out_shape=jax.ShapeDtypeStruct((S, D), pos_embedding.dtype),
        in_specs=[pl.BlockSpec(memory_space=pl.ANY)],       # raw HBM ref, no auto-DMA
        out_specs=pl.BlockSpec(memory_space=pl.ANY),         # written directly by DMA
        scratch_shapes=[pltpu.SemaphoreType.DMA],            # completion semaphore
        cost_estimate=pl.CostEstimate(
            flops=0,
            transcendentals=0,
            bytes_accessed=2 * S * D * itemsize,             # read + write
        ),
    )(pos_embedding)

    # PyTorch returns embedding(pos) with pos of shape (1, S) -> (1, S, D).
    return out[None]


# ---------------------------------------------------------------------------
# Demo / self-check
# ---------------------------------------------------------------------------
if __name__ == "__main__":
    max_len, d_model = 16, 32
    B, S = 2, 8

    key = jax.random.PRNGKey(0)
    ekey, xkey = jax.random.split(key)

    # nn.Embedding(max_len, d_model).weight ~ N(0, 1)
    pos_embedding = jax.random.normal(ekey, (max_len, d_model), jnp.float32)
    # x values are irrelevant to the forward (only its shape is used).
    x = jax.random.randint(xkey, (B, S), 0, 100, dtype=jnp.int32)

    out = learnable_positional_encoding(x, pos_embedding)
    jax.block_until_ready(out)

    # Reference: embedding(arange(S))[None]
    ref = pos_embedding[jnp.arange(S)][None]
    assert out.shape == (1, S, d_model), out.shape
    assert jnp.allclose(out, ref), "mismatch vs reference embedding lookup"

    # Extra check: sublane-unaligned sequence length (no special fallback needed
    # on the DMA path — the copied region is contiguous either way).
    S2 = 5
    x2 = jax.random.randint(xkey, (B, S2), 0, 100, dtype=jnp.int32)
    out2 = learnable_positional_encoding(x2, pos_embedding)
    jax.block_until_ready(out2)
    ref2 = pos_embedding[jnp.arange(S2)][None]
    assert out2.shape == (1, S2, d_model), out2.shape
    assert jnp.allclose(out2, ref2), "mismatch vs reference (unaligned S)"

    print("KERNEL_OK")
</pallas_src>

<mosaic_0001>
module attributes {stable_mosaic.version = 11 : i64} {
  func.func @_pos_embed_dma_kernel(%arg0: memref<16x32xf32, #tpu.memory_space<any>>, %arg1: memref<8x32xf32, #tpu.memory_space<any>>, %arg2: memref<!tpu.dma_semaphore, #tpu.memory_space<semaphore_mem>>) attributes {dimension_semantics = [], scalar_prefetch = 0 : i64, scratch_operands = 1 : i64, tpu.core_type = #tpu.core_type<tc>} {
    %c0_i32 = arith.constant 0 : i32
    %c0_i32_0 = arith.constant 0 : i32
    %0 = tpu.memref_slice %arg0[%c0_i32, %c0_i32_0] : memref<16x32xf32, #tpu.memory_space<any>> -> memref<8x32xf32, #tpu.memory_space<any>>
    tpu.enqueue_dma source(%0 : memref<8x32xf32, #tpu.memory_space<any>>) target(%arg1 : memref<8x32xf32, #tpu.memory_space<any>>) target_semaphore(%arg2 : memref<!tpu.dma_semaphore, #tpu.memory_space<semaphore_mem>>)
    %c0_i32_1 = arith.constant 0 : i32
    %c0_i32_2 = arith.constant 0 : i32
    %1 = tpu.memref_slice %arg0[%c0_i32_1, %c0_i32_2] : memref<16x32xf32, #tpu.memory_space<any>> -> memref<8x32xf32, #tpu.memory_space<any>>
    tpu.wait_dma2 semaphore(%arg2 : memref<!tpu.dma_semaphore, #tpu.memory_space<semaphore_mem>>) src(%1 : memref<8x32xf32, #tpu.memory_space<any>>) dst(%arg1 : memref<8x32xf32, #tpu.memory_space<any>>)
    return
  }
}

</mosaic_0001>

<bundles_post_ra>
// kernel: tpu_custom_call.1
= control target key start
LH: loop header
LB: loop body
LE: loop exit
PB: predicated region body
PF: predicated region fallthrough
CT: control target
= control target key end

     0   :  { %s32_s12 = smov [#allocation2]   ;;  %s33_s13 = smov [#allocation3]   ;;  %s51_s0 = inlined_call_operand.hbm [shape: f32[16,32], index: 0, kind: input, shape index: {}]   ;;  %s52_s1 = inlined_call_operand.hbm [shape: f32[8,32], index: 1, kind: output, shape index: {}]  }
   0x1   :  { %s10_s8 = sshll.u32 %s51_s0, 4  ;;  %s12_s11 = sshll.u32 %s52_s1, 4  ;;  %s11_s8 = int_to_ptr.hbm [resolvable:$true] %s10_s8  ;;  %s13_s11 = int_to_ptr.hbm [resolvable:$true] %s12_s11 }
   0x2   :  { %s34_s14 = smov 0  }
   0x3   :  { %16 = dma.general %s11_s8, 128, %s13_s11, %s32_s12, %s33_s13, [#allocation4], %s34_s14, 0  }
   0x4   :  { %30 = dma.done.wait [#allocation2], 128 }
   0x5   :  { %31 = vsyncadd [#allocation2], 4294967168 }
   0x6   :  { %20 = vsyncmov [#allocation2] }
   0x9   :  { %s21_s15 = vpop.sfrf %20 }
   0xa   :  { %p26_p0 = scmp.ne.s32.totalorder %s21_s15, 0 }
   0xc   :  { %25 = shalt.err (%p26_p0)  }

</bundles_post_ra>
